<compile_context>
chip_gen: v6e
topology: v6e:2x2x1
jax: 0.10.0
libtpu: 0.0.40
codegen_flags: <defaults>
</compile_context>

<pallas_src>
import math

import jax
import jax.numpy as jnp
from jax.experimental import pallas as pl
from jax.experimental.pallas import tpu as pltpu

EPS = 1e-5        # nn.LayerNorm default
CONCAT = 128      # 32 + 32 + 32 + 16 concat layout, padded to one vreg lane width
# With bf16 activations a 2048-row step double-buffers to ~2-3 MiB, far under
# every chip's scoped-VMEM default (16 MiB v5e, 32 MiB v6e/v7x).
DEFAULT_BATCH_TILE = 2048

# ---------------------------------------------------------------------------
# Row indices into the packed (N_VEC_ROWS, pack_w) vector-parameter array.
# ---------------------------------------------------------------------------
_R_DB1, _R_DG1, _R_DBT1 = 0, 1, 2          # decomp layer 1 bias / LN gamma / LN beta (128)
_R_DB2, _R_DG2, _R_DBT2 = 3, 4, 5          # decomp layer 2 (64)
_R_DB3 = 6                                 # decomp embed bias, concat layout lanes 0:32
_R_GB1, _R_GG1, _R_GBT1 = 7, 8, 9          # gap layer 1 (64)
_R_GB2 = 10                                # gap embed bias, lanes 32:64
_R_SB1, _R_SG1, _R_SBT1 = 11, 12, 13       # dos layer 1 (64)
_R_SB2 = 14                                # dos embed bias, lanes 64:96
_R_FB1, _R_FG1, _R_FBT1 = 15, 16, 17       # fermi layer 1 (32)
_R_FB2 = 18                                # fermi embed bias, lanes 96:112
_R_PB, _R_PG, _R_PBT = 19, 20, 21          # final proj bias / LN gamma / LN beta (out_dim)
_N_VEC_ROWS = 22


# ---------------------------------------------------------------------------
# Pallas kernel factory: trace-time specialized on which optional inputs exist.
# ---------------------------------------------------------------------------
def _make_kernel(gap_on, dos_on, fermi_on, out_dim):
    def kernel(*refs):
        refs = list(refs)
        idx = 0
        decomp_ref = refs[idx]; idx += 1
        gap_ref = dos_ref = fermi_ref = None
        if gap_on:
            gap_ref = refs[idx]; idx += 1
        if dos_on:
            dos_ref = refs[idx]; idx += 1
        if fermi_on:
            fermi_ref = refs[idx]; idx += 1
        (dw1, dw2, dw3, gw1, gw2, sw1, sw2, fw1, fw2, pw) = refs[idx:idx + 10]
        vecs = refs[idx + 10]
        out_ref = refs[idx + 11]

        def V(row, n):                      # (1, n) f32 slice of the packed vectors
            return vecs[row:row + 1, 0:n]

        def lin(x_bf, w_ref, b_row, n):     # bf16 operands, f32 MXU accumulation
            return jnp.dot(x_bf, w_ref[...],
                           preferred_element_type=jnp.float32) + V(b_row, n)

        def ln(x, g_row, b_row, n):         # f32 LayerNorm, reuses (x - mean)
            m = jnp.mean(x, axis=-1, keepdims=True)
            d = x - m
            v = jnp.mean(d * d, axis=-1, keepdims=True)
            return d * jax.lax.rsqrt(v + EPS) * V(g_row, n) + V(b_row, n)

        relu = lambda x: jnp.maximum(x, 0.0)
        bf16 = lambda x: x.astype(jnp.bfloat16)

        # ---- decomp_encoder: Lin->LN->ReLU->(Dropout=id)->Lin->LN->ReLU->Lin
        # Its last Linear is zero-padded to 128 lanes (live lanes 0:32), so
        # `combined` is directly the 128-lane concat-layout register.
        h = relu(ln(lin(decomp_ref[...], dw1, _R_DB1, 128), _R_DG1, _R_DBT1, 128))
        h = relu(ln(lin(bf16(h), dw2, _R_DB2, 64), _R_DG2, _R_DBT2, 64))
        combined = lin(bf16(h), dw3, _R_DB3, CONCAT)                  # (TB, 128) f32

        # Missing optional branches contribute an exact-zero embedding block
        # (same as torch.zeros concat) and are dropped at trace time.
        if gap_on:    # gap_analyzer: Lin->LN->ReLU->Lin->ReLU  (lanes 32:64)
            h = relu(ln(lin(gap_ref[...], gw1, _R_GB1, 64), _R_GG1, _R_GBT1, 64))
            combined = combined + relu(lin(bf16(h), gw2, _R_GB2, CONCAT))
        if dos_on:    # dos_encoder: Lin->LN->ReLU->Lin          (lanes 64:96)
            h = relu(ln(lin(dos_ref[...], sw1, _R_SB1, 64), _R_SG1, _R_SBT1, 64))
            combined = combined + lin(bf16(h), sw2, _R_SB2, CONCAT)
        if fermi_on:  # fermi_encoder: Lin->LN->ReLU->Lin        (lanes 96:112)
            h = relu(ln(lin(fermi_ref[...], fw1, _R_FB1, 32), _R_FG1, _R_FBT1, 32))
            combined = combined + lin(bf16(h), fw2, _R_FB2, CONCAT)

        # ---- final_proj: ONE K=128 MXU pass -> LayerNorm -> ReLU -> (Dropout=id)
        fused = lin(bf16(combined), pw, _R_PB, out_dim)               # (TB, out_dim)
        out_ref[...] = relu(ln(fused, _R_PG, _R_PBT, out_dim)).astype(out_ref.dtype)

    return kernel


# ---------------------------------------------------------------------------
# Parameter construction (mimics nn.Linear / nn.LayerNorm default init).
# ---------------------------------------------------------------------------
def _linear_params(key, fan_in, fan_out):
    kw, kb = jax.random.split(key)
    bound = 1.0 / math.sqrt(fan_in)
    w = jax.random.uniform(kw, (fan_in, fan_out), jnp.float32, -bound, bound)
    b = jax.random.uniform(kb, (fan_out,), jnp.float32, -bound, bound)
    return w, b


def _pad_cols(w, total_cols, off):
    """Zero-pad a (K, n) weight into lanes [off, off+n) of a (K, total_cols) block."""
    return jnp.zeros((w.shape[0], total_cols), jnp.float32).at[:, off:off + w.shape[1]].set(w)


def make_params(key, decomposition_dim, gap_dim, dos_dim, fermi_dim, output_dim):
    keys = iter(jax.random.split(key, 16))
    pack_w = max(CONCAT, output_dim)

    dw1, db1 = _linear_params(next(keys), decomposition_dim, 128)
    dw2, db2 = _linear_params(next(keys), 128, 64)
    dw3, db3 = _linear_params(next(keys), 64, 32)
    gw1, gb1 = _linear_params(next(keys), gap_dim, 64)
    gw2, gb2 = _linear_params(next(keys), 64, 32)
    sw1, sb1 = _linear_params(next(keys), dos_dim, 64)
    sw2, sb2 = _linear_params(next(keys), 64, 32)
    fw1, fb1 = _linear_params(next(keys), fermi_dim, 32)
    fw2, fb2 = _linear_params(next(keys), 32, 16)
    pw, pb = _linear_params(next(keys), 32 + 32 + 32 + 16, output_dim)

    # Packed 1-row vector params (biases / LN gammas / betas), all f32.
    vecs = jnp.zeros((_N_VEC_ROWS, pack_w), jnp.float32)
    ones = lambda n: jnp.ones((n,), jnp.float32)
    vecs = vecs.at[_R_DB1, :128].set(db1)
    vecs = vecs.at[_R_DG1, :128].set(ones(128))
    vecs = vecs.at[_R_DB2, :64].set(db2)
    vecs = vecs.at[_R_DG2, :64].set(ones(64))
    vecs = vecs.at[_R_DB3, 0:32].set(db3)          # concat layout lanes 0:32
    vecs = vecs.at[_R_GB1, :64].set(gb1)
    vecs = vecs.at[_R_GG1, :64].set(ones(64))
    vecs = vecs.at[_R_GB2, 32:64].set(gb2)         # lanes 32:64
    vecs = vecs.at[_R_SB1, :64].set(sb1)
    vecs = vecs.at[_R_SG1, :64].set(ones(64))
    vecs = vecs.at[_R_SB2, 64:96].set(sb2)         # lanes 64:96
    vecs = vecs.at[_R_FB1, :32].set(fb1)
    vecs = vecs.at[_R_FG1, :32].set(ones(32))
    vecs = vecs.at[_R_FB2, 96:112].set(fb2)        # lanes 96:112
    vecs = vecs.at[_R_PB, :output_dim].set(pb)
    vecs = vecs.at[_R_PG, :output_dim].set(ones(output_dim))
    # All LN betas (rows _R_*BT*, _R_PBT) stay zero-initialized.

    # Matmul weights (bf16).  Embedding-layer weights are padded to the
    # 128-lane concat layout; final_proj weight is row-padded 112 -> 128.
    dw3p = _pad_cols(dw3, CONCAT, 0)
    gw2p = _pad_cols(gw2, CONCAT, 32)
    sw2p = _pad_cols(sw2, CONCAT, 64)
    fw2p = _pad_cols(fw2, CONCAT, 96)
    pwp = jnp.zeros((CONCAT, output_dim), jnp.float32).at[:112, :].set(pw)
    weights = tuple(w.astype(jnp.bfloat16) for w in
                    (dw1, dw2, dw3p, gw1, gw2p, sw1, sw2p, fw1, fw2p, pwp))

    params = dict(weights=weights, vecs=vecs)
    raw = dict(dw1=dw1, db1=db1, dw2=dw2, db2=db2, dw3=dw3, db3=db3,
               gw1=gw1, gb1=gb1, gw2=gw2, gb2=gb2,
               sw1=sw1, sb1=sb1, sw2=sw2, sb2=sb2,
               fw1=fw1, fb1=fb1, fw2=fw2, fb2=fb2,
               pw=pw, pb=pb)
    dims = dict(decomposition_dim=decomposition_dim, gap_dim=gap_dim,
                dos_dim=dos_dim, fermi_dim=fermi_dim, output_dim=output_dim)
    return params, raw, dims


# ---------------------------------------------------------------------------
# Wrapper: optional-input handling, batch tiling, pallas_call.
# ---------------------------------------------------------------------------
def _pick_batch_tile(b, batch_tile):
    if b <= 8:
        return b
    # Cap at half the batch (rounded up to a multiple of 8) so the grid has
    # >= 2 steps whenever b >= 16 -> both v7x TensorCores get work.
    half = ((pl.cdiv(b, 2) + 7) // 8) * 8
    return max(8, min(batch_tile, half))


def enhanced_kspace_forward(params, dims, decomposition_features,
                            gap_features=None, dos_features=None,
                            fermi_features=None, *,
                            batch_tile=DEFAULT_BATCH_TILE,
                            out_dtype=jnp.float32):
    b = decomposition_features.shape[0]
    out_dim = dims["output_dim"]

    def present(x):
        return x is not None and x.size > 0

    gap_on = present(gap_features)
    dos_on = present(dos_features)
    fermi_on = present(fermi_features)

    # Activations are DMA'd as bf16 (half the HBM traffic); matmuls accumulate
    # in f32 on the MXU, LayerNorm math stays f32.
    feats = [decomposition_features.astype(jnp.bfloat16)]
    if gap_on:
        feats.append(gap_features.astype(jnp.bfloat16))
    if dos_on:
        feats.append(dos_features.astype(jnp.bfloat16))
    if fermi_on:
        feats.append(fermi_features.astype(jnp.bfloat16))

    tb = _pick_batch_tile(b, batch_tile)
    grid = (pl.cdiv(b, tb),)

    feat_specs = [pl.BlockSpec((tb, f.shape[1]), lambda i: (i, 0)) for f in feats]
    # Weights / packed vectors: full-array blocks, constant index -> resident
    # in VMEM, not re-fetched across grid steps.
    weight_specs = [pl.BlockSpec(w.shape, lambda i: (0, 0)) for w in params["weights"]]
    vecs_spec = pl.BlockSpec(params["vecs"].shape, lambda i: (0, 0))
    # Output is exactly (b, out_dim): no padded write, no post-kernel slice.
    out_spec = pl.BlockSpec((tb, out_dim), lambda i: (i, 0))

    kernel = _make_kernel(gap_on, dos_on, fermi_on, out_dim)

    return pl.pallas_call(
        kernel,
        out_shape=jax.ShapeDtypeStruct((b, out_dim), out_dtype),
        grid=grid,
        in_specs=feat_specs + weight_specs + [vecs_spec],
        out_specs=out_spec,
        compiler_params=pltpu.CompilerParams(
            dimension_semantics=("parallel",)),   # shard batch tiles across TCs (v7x)
    )(*feats, *params["weights"], params["vecs"])


# ---------------------------------------------------------------------------
# Pure-JAX reference (same bf16-matmul / f32-LN math, built from RAW params)
# for a correctness check of the kernel + packing pipeline.
# ---------------------------------------------------------------------------
def _ref_forward(raw, decomp, gap, dos, fermi):
    def mm(x, w):
        return jnp.dot(x.astype(jnp.bfloat16), w.astype(jnp.bfloat16),
                       preferred_element_type=jnp.float32)

    def ln(x):
        m = x.mean(-1, keepdims=True)
        v = ((x - m) ** 2).mean(-1, keepdims=True)
        return (x - m) / jnp.sqrt(v + EPS)    # gamma=1, beta=0 (default init)

    relu = lambda x: jnp.maximum(x, 0.0)
    B = decomp.shape[0]

    h = relu(ln(mm(decomp, raw["dw1"]) + raw["db1"]))
    h = relu(ln(mm(h, raw["dw2"]) + raw["db2"]))
    d_emb = mm(h, raw["dw3"]) + raw["db3"]

    if gap is not None and gap.size > 0:
        h = relu(ln(mm(gap, raw["gw1"]) + raw["gb1"]))
        g_emb = relu(mm(h, raw["gw2"]) + raw["gb2"])
    else:
        g_emb = jnp.zeros((B, 32), jnp.float32)
    if dos is not None and dos.size > 0:
        h = relu(ln(mm(dos, raw["sw1"]) + raw["sb1"]))
        s_emb = mm(h, raw["sw2"]) + raw["sb2"]
    else:
        s_emb = jnp.zeros((B, 32), jnp.float32)
    if fermi is not None and fermi.size > 0:
        h = relu(ln(mm(fermi, raw["fw1"]) + raw["fb1"]))
        f_emb = mm(h, raw["fw2"]) + raw["fb2"]
    else:
        f_emb = jnp.zeros((B, 16), jnp.float32)

    comb = jnp.concatenate([d_emb, g_emb, s_emb, f_emb], axis=-1)
    return relu(ln(mm(comb, raw["pw"]) + raw["pb"]))


if __name__ == "__main__":
    BATCH = 8
    DECOMP_DIM, GAP_DIM, DOS_DIM, FERMI_DIM, OUT_DIM = 64, 8, 32, 16, 64

    params, raw, dims = make_params(jax.random.PRNGKey(42),
                                    DECOMP_DIM, GAP_DIM, DOS_DIM, FERMI_DIM, OUT_DIM)

    kd, kg, ks, kf = jax.random.split(jax.random.PRNGKey(0), 4)
    decomp = jax.random.normal(kd, (BATCH, DECOMP_DIM), jnp.float32)
    gap = jax.random.normal(kg, (BATCH, GAP_DIM), jnp.float32)
    dos = jax.random.normal(ks, (BATCH, DOS_DIM), jnp.float32)
    fermi = jax.random.normal(kf, (BATCH, FERMI_DIM), jnp.float32)

    # All optional inputs present.
    out = jax.block_until_ready(
        enhanced_kspace_forward(params, dims, decomp, gap, dos, fermi))
    ref = _ref_forward(raw, decomp, gap, dos, fermi)
    assert out.shape == (BATCH, OUT_DIM)
    assert jnp.allclose(out, ref, atol=1e-2, rtol=1e-2), \
        float(jnp.max(jnp.abs(out - ref)))

    # Specialized "gap missing" variant: no dummy array, no gap_analyzer work.
    out2 = jax.block_until_ready(
        enhanced_kspace_forward(params, dims, decomp, None, dos, fermi))
    ref2 = _ref_forward(raw, decomp, None, dos, fermi)
    assert out2.shape == (BATCH, OUT_DIM)
    assert jnp.allclose(out2, ref2, atol=1e-2, rtol=1e-2), \
        float(jnp.max(jnp.abs(out2 - ref2)))

    print("KERNEL_OK")
</pallas_src>

<mosaic_0001>
module attributes {stable_mosaic.version = 11 : i64} {
  func.func @kernel(%arg0: i32, %arg1: memref<8x64xbf16, #tpu.memory_space<vmem>>, %arg2: memref<8x8xbf16, #tpu.memory_space<vmem>>, %arg3: memref<8x32xbf16, #tpu.memory_space<vmem>>, %arg4: memref<8x16xbf16, #tpu.memory_space<vmem>>, %arg5: memref<64x128xbf16, #tpu.memory_space<vmem>>, %arg6: memref<128x64xbf16, #tpu.memory_space<vmem>>, %arg7: memref<64x128xbf16, #tpu.memory_space<vmem>>, %arg8: memref<8x64xbf16, #tpu.memory_space<vmem>>, %arg9: memref<64x128xbf16, #tpu.memory_space<vmem>>, %arg10: memref<32x64xbf16, #tpu.memory_space<vmem>>, %arg11: memref<64x128xbf16, #tpu.memory_space<vmem>>, %arg12: memref<16x32xbf16, #tpu.memory_space<vmem>>, %arg13: memref<32x128xbf16, #tpu.memory_space<vmem>>, %arg14: memref<128x64xbf16, #tpu.memory_space<vmem>>, %arg15: memref<22x128xf32, #tpu.memory_space<vmem>>, %arg16: memref<8x64xf32, #tpu.memory_space<vmem>>) attributes {dimension_semantics = [#tpu.dimension_semantics<parallel>], iteration_bounds = array<i64: 1>, scalar_prefetch = 0 : i64, scratch_operands = 0 : i64, tpu.core_type = #tpu.core_type<tc>, window_params = [{transform_indices = @transform_0, window_bounds = array<i64: 8, 64>}, {transform_indices = @transform_1, window_bounds = array<i64: 8, 8>}, {transform_indices = @transform_2, window_bounds = array<i64: 8, 32>}, {transform_indices = @transform_3, window_bounds = array<i64: 8, 16>}, {pipeline_mode = #tpu.pipeline_mode<synchronous>, transform_indices = @transform_4, window_bounds = array<i64: 64, 128>}, {pipeline_mode = #tpu.pipeline_mode<synchronous>, transform_indices = @transform_5, window_bounds = array<i64: 128, 64>}, {pipeline_mode = #tpu.pipeline_mode<synchronous>, transform_indices = @transform_6, window_bounds = array<i64: 64, 128>}, {pipeline_mode = #tpu.pipeline_mode<synchronous>, transform_indices = @transform_7, window_bounds = array<i64: 8, 64>}, {pipeline_mode = #tpu.pipeline_mode<synchronous>, transform_indices = @transform_8, window_bounds = array<i64: 64, 128>}, {pipeline_mode = #tpu.pipeline_mode<synchronous>, transform_indices = @transform_9, window_bounds = array<i64: 32, 64>}, {pipeline_mode = #tpu.pipeline_mode<synchronous>, transform_indices = @transform_10, window_bounds = array<i64: 64, 128>}, {pipeline_mode = #tpu.pipeline_mode<synchronous>, transform_indices = @transform_11, window_bounds = array<i64: 16, 32>}, {pipeline_mode = #tpu.pipeline_mode<synchronous>, transform_indices = @transform_12, window_bounds = array<i64: 32, 128>}, {pipeline_mode = #tpu.pipeline_mode<synchronous>, transform_indices = @transform_13, window_bounds = array<i64: 128, 64>}, {pipeline_mode = #tpu.pipeline_mode<synchronous>, transform_indices = @transform_14, window_bounds = array<i64: 22, 128>}, {transform_indices = @transform_15, window_bounds = array<i64: 8, 64>}]} {
    %c0 = arith.constant 0 : index
    %c0_0 = arith.constant 0 : index
    %0 = vector.load %arg1[%c0, %c0_0] : memref<8x64xbf16, #tpu.memory_space<vmem>>, vector<8x64xbf16>
    %c0_1 = arith.constant 0 : index
    %c0_2 = arith.constant 0 : index
    %1 = vector.load %arg5[%c0_1, %c0_2] : memref<64x128xbf16, #tpu.memory_space<vmem>>, vector<64x128xbf16>
    %cst = arith.constant dense<0.000000e+00> : vector<8x128xf32>
    %2 = tpu.matmul %0, %1, %cst {dimension_numbers = #tpu.dot_dimension_numbers<[1], [0], [0], [1], [0, 0, 1, 1], [], []>} : vector<8x64xbf16>, vector<64x128xbf16>, vector<8x128xf32> -> vector<8x128xf32>
    %c0_3 = arith.constant 0 : index
    %c0_4 = arith.constant 0 : index
    %3 = vector.load %arg15[%c0_3, %c0_4] : memref<22x128xf32, #tpu.memory_space<vmem>>, vector<1x128xf32>
    %4 = vector.broadcast %3 : vector<1x128xf32> to vector<8x128xf32>
    %5 = arith.addf %2, %4 : vector<8x128xf32>
    %cst_5 = arith.constant dense<0.000000e+00> : vector<8xf32>
    %6 = vector.multi_reduction <add>, %5, %cst_5 [1] : vector<8x128xf32> to vector<8xf32>
    %7 = vector.shape_cast %6 : vector<8xf32> to vector<8x1xf32>
    %cst_6 = arith.constant 1.280000e+02 : f32
    %8 = vector.broadcast %cst_6 : f32 to vector<8x1xf32>
    %9 = arith.divf %7, %8 : vector<8x1xf32>
    %10 = vector.broadcast %9 : vector<8x1xf32> to vector<8x128xf32>
    %11 = arith.subf %5, %10 : vector<8x128xf32>
    %12 = arith.mulf %11, %11 : vector<8x128xf32>
    %cst_7 = arith.constant dense<0.000000e+00> : vector<8xf32>
    %13 = vector.multi_reduction <add>, %12, %cst_7 [1] : vector<8x128xf32> to vector<8xf32>
    %14 = vector.shape_cast %13 : vector<8xf32> to vector<8x1xf32>
    %cst_8 = arith.constant 1.280000e+02 : f32
    %15 = vector.broadcast %cst_8 : f32 to vector<8x1xf32>
    %16 = arith.divf %14, %15 : vector<8x1xf32>
    %cst_9 = arith.constant 9.99999974E-6 : f32
    %17 = vector.broadcast %cst_9 : f32 to vector<8x1xf32>
    %18 = arith.addf %16, %17 : vector<8x1xf32>
    %19 = math.rsqrt %18 : vector<8x1xf32>
    %20 = vector.broadcast %19 : vector<8x1xf32> to vector<8x128xf32>
    %21 = arith.mulf %11, %20 : vector<8x128xf32>
    %c1 = arith.constant 1 : index
    %c0_10 = arith.constant 0 : index
    %22 = vector.load %arg15[%c1, %c0_10] : memref<22x128xf32, #tpu.memory_space<vmem>>, vector<1x128xf32>
    %23 = vector.broadcast %22 : vector<1x128xf32> to vector<8x128xf32>
    %24 = arith.mulf %21, %23 : vector<8x128xf32>
    %c2 = arith.constant 2 : index
    %c0_11 = arith.constant 0 : index
    %25 = vector.load %arg15[%c2, %c0_11] : memref<22x128xf32, #tpu.memory_space<vmem>>, vector<1x128xf32>
    %26 = vector.broadcast %25 : vector<1x128xf32> to vector<8x128xf32>
    %27 = arith.addf %24, %26 : vector<8x128xf32>
    %cst_12 = arith.constant 0.000000e+00 : f32
    %28 = vector.broadcast %cst_12 : f32 to vector<8x128xf32>
    %29 = arith.maximumf %27, %28 : vector<8x128xf32>
    %30 = arith.truncf %29 : vector<8x128xf32> to vector<8x128xbf16>
    %c0_13 = arith.constant 0 : index
    %c0_14 = arith.constant 0 : index
    %31 = vector.load %arg6[%c0_13, %c0_14] : memref<128x64xbf16, #tpu.memory_space<vmem>>, vector<128x64xbf16>
    %cst_15 = arith.constant dense<0.000000e+00> : vector<8x64xf32>
    %32 = tpu.matmul %30, %31, %cst_15 {dimension_numbers = #tpu.dot_dimension_numbers<[1], [0], [0], [1], [0, 0, 1, 1], [], []>} : vector<8x128xbf16>, vector<128x64xbf16>, vector<8x64xf32> -> vector<8x64xf32>
    %c3 = arith.constant 3 : index
    %c0_16 = arith.constant 0 : index
    %33 = vector.load %arg15[%c3, %c0_16] : memref<22x128xf32, #tpu.memory_space<vmem>>, vector<1x64xf32>
    %34 = vector.broadcast %33 : vector<1x64xf32> to vector<8x64xf32>
    %35 = arith.addf %32, %34 : vector<8x64xf32>
    %cst_17 = arith.constant dense<0.000000e+00> : vector<8xf32>
    %36 = vector.multi_reduction <add>, %35, %cst_17 [1] : vector<8x64xf32> to vector<8xf32>
    %37 = vector.shape_cast %36 : vector<8xf32> to vector<8x1xf32>
    %cst_18 = arith.constant 6.400000e+01 : f32
    %38 = vector.broadcast %cst_18 : f32 to vector<8x1xf32>
    %39 = arith.divf %37, %38 : vector<8x1xf32>
    %40 = vector.broadcast %39 : vector<8x1xf32> to vector<8x64xf32>
    %41 = arith.subf %35, %40 : vector<8x64xf32>
    %42 = arith.mulf %41, %41 : vector<8x64xf32>
    %cst_19 = arith.constant dense<0.000000e+00> : vector<8xf32>
    %43 = vector.multi_reduction <add>, %42, %cst_19 [1] : vector<8x64xf32> to vector<8xf32>
    %44 = vector.shape_cast %43 : vector<8xf32> to vector<8x1xf32>
    %cst_20 = arith.constant 6.400000e+01 : f32
    %45 = vector.broadcast %cst_20 : f32 to vector<8x1xf32>
    %46 = arith.divf %44, %45 : vector<8x1xf32>
    %cst_21 = arith.constant 9.99999974E-6 : f32
    %47 = vector.broadcast %cst_21 : f32 to vector<8x1xf32>
    %48 = arith.addf %46, %47 : vector<8x1xf32>
    %49 = math.rsqrt %48 : vector<8x1xf32>
    %50 = vector.broadcast %49 : vector<8x1xf32> to vector<8x64xf32>
    %51 = arith.mulf %41, %50 : vector<8x64xf32>
    %c4 = arith.constant 4 : index
    %c0_22 = arith.constant 0 : index
    %52 = vector.load %arg15[%c4, %c0_22] : memref<22x128xf32, #tpu.memory_space<vmem>>, vector<1x64xf32>
    %53 = vector.broadcast %52 : vector<1x64xf32> to vector<8x64xf32>
    %54 = arith.mulf %51, %53 : vector<8x64xf32>
    %c5 = arith.constant 5 : index
    %c0_23 = arith.constant 0 : index
    %55 = vector.load %arg15[%c5, %c0_23] : memref<22x128xf32, #tpu.memory_space<vmem>>, vector<1x64xf32>
    %56 = vector.broadcast %55 : vector<1x64xf32> to vector<8x64xf32>
    %57 = arith.addf %54, %56 : vector<8x64xf32>
    %cst_24 = arith.constant 0.000000e+00 : f32
    %58 = vector.broadcast %cst_24 : f32 to vector<8x64xf32>
    %59 = arith.maximumf %57, %58 : vector<8x64xf32>
    %60 = arith.truncf %59 : vector<8x64xf32> to vector<8x64xbf16>
    %c0_25 = arith.constant 0 : index
    %c0_26 = arith.constant 0 : index
    %61 = vector.load %arg7[%c0_25, %c0_26] : memref<64x128xbf16, #tpu.memory_space<vmem>>, vector<64x128xbf16>
    %cst_27 = arith.constant dense<0.000000e+00> : vector<8x128xf32>
    %62 = tpu.matmul %60, %61, %cst_27 {dimension_numbers = #tpu.dot_dimension_numbers<[1], [0], [0], [1], [0, 0, 1, 1], [], []>} : vector<8x64xbf16>, vector<64x128xbf16>, vector<8x128xf32> -> vector<8x128xf32>
    %c6 = arith.constant 6 : index
    %c0_28 = arith.constant 0 : index
    %63 = vector.load %arg15[%c6, %c0_28] : memref<22x128xf32, #tpu.memory_space<vmem>>, vector<1x128xf32>
    %64 = vector.broadcast %63 : vector<1x128xf32> to vector<8x128xf32>
    %65 = arith.addf %62, %64 : vector<8x128xf32>
    %c0_29 = arith.constant 0 : index
    %c0_30 = arith.constant 0 : index
    %66 = vector.load %arg2[%c0_29, %c0_30] : memref<8x8xbf16, #tpu.memory_space<vmem>>, vector<8x8xbf16>
    %c0_31 = arith.constant 0 : index
    %c0_32 = arith.constant 0 : index
    %67 = vector.load %arg8[%c0_31, %c0_32] : memref<8x64xbf16, #tpu.memory_space<vmem>>, vector<8x64xbf16>
    %cst_33 = arith.constant dense<0.000000e+00> : vector<8x64xf32>
    %68 = tpu.matmul %66, %67, %cst_33 {dimension_numbers = #tpu.dot_dimension_numbers<[1], [0], [0], [1], [0, 0, 1, 1], [], []>} : vector<8x8xbf16>, vector<8x64xbf16>, vector<8x64xf32> -> vector<8x64xf32>
    %c7 = arith.constant 7 : index
    %c0_34 = arith.constant 0 : index
    %69 = vector.load %arg15[%c7, %c0_34] : memref<22x128xf32, #tpu.memory_space<vmem>>, vector<1x64xf32>
    %70 = vector.broadcast %69 : vector<1x64xf32> to vector<8x64xf32>
    %71 = arith.addf %68, %70 : vector<8x64xf32>
    %cst_35 = arith.constant dense<0.000000e+00> : vector<8xf32>
    %72 = vector.multi_reduction <add>, %71, %cst_35 [1] : vector<8x64xf32> to vector<8xf32>
    %73 = vector.shape_cast %72 : vector<8xf32> to vector<8x1xf32>
    %cst_36 = arith.constant 6.400000e+01 : f32
    %74 = vector.broadcast %cst_36 : f32 to vector<8x1xf32>
    %75 = arith.divf %73, %74 : vector<8x1xf32>
    %76 = vector.broadcast %75 : vector<8x1xf32> to vector<8x64xf32>
    %77 = arith.subf %71, %76 : vector<8x64xf32>
    %78 = arith.mulf %77, %77 : vector<8x64xf32>
    %cst_37 = arith.constant dense<0.000000e+00> : vector<8xf32>
    %79 = vector.multi_reduction <add>, %78, %cst_37 [1] : vector<8x64xf32> to vector<8xf32>
    %80 = vector.shape_cast %79 : vector<8xf32> to vector<8x1xf32>
    %cst_38 = arith.constant 6.400000e+01 : f32
    %81 = vector.broadcast %cst_38 : f32 to vector<8x1xf32>
    %82 = arith.divf %80, %81 : vector<8x1xf32>
    %cst_39 = arith.constant 9.99999974E-6 : f32
    %83 = vector.broadcast %cst_39 : f32 to vector<8x1xf32>
    %84 = arith.addf %82, %83 : vector<8x1xf32>
    %85 = math.rsqrt %84 : vector<8x1xf32>
    %86 = vector.broadcast %85 : vector<8x1xf32> to vector<8x64xf32>
    %87 = arith.mulf %77, %86 : vector<8x64xf32>
    %c8 = arith.constant 8 : index
    %c0_40 = arith.constant 0 : index
    %88 = vector.load %arg15[%c8, %c0_40] : memref<22x128xf32, #tpu.memory_space<vmem>>, vector<1x64xf32>
    %89 = vector.broadcast %88 : vector<1x64xf32> to vector<8x64xf32>
    %90 = arith.mulf %87, %89 : vector<8x64xf32>
    %c9 = arith.constant 9 : index
    %c0_41 = arith.constant 0 : index
    %91 = vector.load %arg15[%c9, %c0_41] : memref<22x128xf32, #tpu.memory_space<vmem>>, vector<1x64xf32>
    %92 = vector.broadcast %91 : vector<1x64xf32> to vector<8x64xf32>
    %93 = arith.addf %90, %92 : vector<8x64xf32>
    %cst_42 = arith.constant 0.000000e+00 : f32
    %94 = vector.broadcast %cst_42 : f32 to vector<8x64xf32>
    %95 = arith.maximumf %93, %94 : vector<8x64xf32>
    %96 = arith.truncf %95 : vector<8x64xf32> to vector<8x64xbf16>
    %c0_43 = arith.constant 0 : index
    %c0_44 = arith.constant 0 : index
    %97 = vector.load %arg9[%c0_43, %c0_44] : memref<64x128xbf16, #tpu.memory_space<vmem>>, vector<64x128xbf16>
    %cst_45 = arith.constant dense<0.000000e+00> : vector<8x128xf32>
    %98 = tpu.matmul %96, %97, %cst_45 {dimension_numbers = #tpu.dot_dimension_numbers<[1], [0], [0], [1], [0, 0, 1, 1], [], []>} : vector<8x64xbf16>, vector<64x128xbf16>, vector<8x128xf32> -> vector<8x128xf32>
    %c10 = arith.constant 10 : index
    %c0_46 = arith.constant 0 : index
    %99 = vector.load %arg15[%c10, %c0_46] : memref<22x128xf32, #tpu.memory_space<vmem>>, vector<1x128xf32>
    %100 = vector.broadcast %99 : vector<1x128xf32> to vector<8x128xf32>
    %101 = arith.addf %98, %100 : vector<8x128xf32>
    %cst_47 = arith.constant 0.000000e+00 : f32
    %102 = vector.broadcast %cst_47 : f32 to vector<8x128xf32>
    %103 = arith.maximumf %101, %102 : vector<8x128xf32>
    %104 = arith.addf %65, %103 : vector<8x128xf32>
    %c0_48 = arith.constant 0 : index
    %c0_49 = arith.constant 0 : index
    %105 = vector.load %arg3[%c0_48, %c0_49] : memref<8x32xbf16, #tpu.memory_space<vmem>>, vector<8x32xbf16>
    %c0_50 = arith.constant 0 : index
    %c0_51 = arith.constant 0 : index
    %106 = vector.load %arg10[%c0_50, %c0_51] : memref<32x64xbf16, #tpu.memory_space<vmem>>, vector<32x64xbf16>
    %cst_52 = arith.constant dense<0.000000e+00> : vector<8x64xf32>
    %107 = tpu.matmul %105, %106, %cst_52 {dimension_numbers = #tpu.dot_dimension_numbers<[1], [0], [0], [1], [0, 0, 1, 1], [], []>} : vector<8x32xbf16>, vector<32x64xbf16>, vector<8x64xf32> -> vector<8x64xf32>
    %c11 = arith.constant 11 : index
    %c0_53 = arith.constant 0 : index
    %108 = vector.load %arg15[%c11, %c0_53] : memref<22x128xf32, #tpu.memory_space<vmem>>, vector<1x64xf32>
    %109 = vector.broadcast %108 : vector<1x64xf32> to vector<8x64xf32>
    %110 = arith.addf %107, %109 : vector<8x64xf32>
    %cst_54 = arith.constant dense<0.000000e+00> : vector<8xf32>
    %111 = vector.multi_reduction <add>, %110, %cst_54 [1] : vector<8x64xf32> to vector<8xf32>
    %112 = vector.shape_cast %111 : vector<8xf32> to vector<8x1xf32>
    %cst_55 = arith.constant 6.400000e+01 : f32
    %113 = vector.broadcast %cst_55 : f32 to vector<8x1xf32>
    %114 = arith.divf %112, %113 : vector<8x1xf32>
    %115 = vector.broadcast %114 : vector<8x1xf32> to vector<8x64xf32>
    %116 = arith.subf %110, %115 : vector<8x64xf32>
    %117 = arith.mulf %116, %116 : vector<8x64xf32>
    %cst_56 = arith.constant dense<0.000000e+00> : vector<8xf32>
    %118 = vector.multi_reduction <add>, %117, %cst_56 [1] : vector<8x64xf32> to vector<8xf32>
    %119 = vector.shape_cast %118 : vector<8xf32> to vector<8x1xf32>
    %cst_57 = arith.constant 6.400000e+01 : f32
    %120 = vector.broadcast %cst_57 : f32 to vector<8x1xf32>
    %121 = arith.divf %119, %120 : vector<8x1xf32>
    %cst_58 = arith.constant 9.99999974E-6 : f32
    %122 = vector.broadcast %cst_58 : f32 to vector<8x1xf32>
    %123 = arith.addf %121, %122 : vector<8x1xf32>
    %124 = math.rsqrt %123 : vector<8x1xf32>
    %125 = vector.broadcast %124 : vector<8x1xf32> to vector<8x64xf32>
    %126 = arith.mulf %116, %125 : vector<8x64xf32>
    %c12 = arith.constant 12 : index
    %c0_59 = arith.constant 0 : index
    %127 = vector.load %arg15[%c12, %c0_59] : memref<22x128xf32, #tpu.memory_space<vmem>>, vector<1x64xf32>
    %128 = vector.broadcast %127 : vector<1x64xf32> to vector<8x64xf32>
    %129 = arith.mulf %126, %128 : vector<8x64xf32>
    %c13 = arith.constant 13 : index
    %c0_60 = arith.constant 0 : index
    %130 = vector.load %arg15[%c13, %c0_60] : memref<22x128xf32, #tpu.memory_space<vmem>>, vector<1x64xf32>
    %131 = vector.broadcast %130 : vector<1x64xf32> to vector<8x64xf32>
    %132 = arith.addf %129, %131 : vector<8x64xf32>
    %cst_61 = arith.constant 0.000000e+00 : f32
    %133 = vector.broadcast %cst_61 : f32 to vector<8x64xf32>
    %134 = arith.maximumf %132, %133 : vector<8x64xf32>
    %135 = arith.truncf %134 : vector<8x64xf32> to vector<8x64xbf16>
    %c0_62 = arith.constant 0 : index
    %c0_63 = arith.constant 0 : index
    %136 = vector.load %arg11[%c0_62, %c0_63] : memref<64x128xbf16, #tpu.memory_space<vmem>>, vector<64x128xbf16>
    %cst_64 = arith.constant dense<0.000000e+00> : vector<8x128xf32>
    %137 = tpu.matmul %135, %136, %cst_64 {dimension_numbers = #tpu.dot_dimension_numbers<[1], [0], [0], [1], [0, 0, 1, 1], [], []>} : vector<8x64xbf16>, vector<64x128xbf16>, vector<8x128xf32> -> vector<8x128xf32>
    %c14 = arith.constant 14 : index
    %c0_65 = arith.constant 0 : index
    %138 = vector.load %arg15[%c14, %c0_65] : memref<22x128xf32, #tpu.memory_space<vmem>>, vector<1x128xf32>
    %139 = vector.broadcast %138 : vector<1x128xf32> to vector<8x128xf32>
    %140 = arith.addf %137, %139 : vector<8x128xf32>
    %141 = arith.addf %104, %140 : vector<8x128xf32>
    %c0_66 = arith.constant 0 : index
    %c0_67 = arith.constant 0 : index
    %142 = vector.load %arg4[%c0_66, %c0_67] : memref<8x16xbf16, #tpu.memory_space<vmem>>, vector<8x16xbf16>
    %c0_68 = arith.constant 0 : index
    %c0_69 = arith.constant 0 : index
    %143 = vector.load %arg12[%c0_68, %c0_69] : memref<16x32xbf16, #tpu.memory_space<vmem>>, vector<16x32xbf16>
    %cst_70 = arith.constant dense<0.000000e+00> : vector<8x32xf32>
    %144 = tpu.matmul %142, %143, %cst_70 {dimension_numbers = #tpu.dot_dimension_numbers<[1], [0], [0], [1], [0, 0, 1, 1], [], []>} : vector<8x16xbf16>, vector<16x32xbf16>, vector<8x32xf32> -> vector<8x32xf32>
    %c15 = arith.constant 15 : index
    %c0_71 = arith.constant 0 : index
    %145 = vector.load %arg15[%c15, %c0_71] : memref<22x128xf32, #tpu.memory_space<vmem>>, vector<1x32xf32>
    %146 = vector.broadcast %145 : vector<1x32xf32> to vector<8x32xf32>
    %147 = arith.addf %144, %146 : vector<8x32xf32>
    %cst_72 = arith.constant dense<0.000000e+00> : vector<8xf32>
    %148 = vector.multi_reduction <add>, %147, %cst_72 [1] : vector<8x32xf32> to vector<8xf32>
    %149 = vector.shape_cast %148 : vector<8xf32> to vector<8x1xf32>
    %cst_73 = arith.constant 3.200000e+01 : f32
    %150 = vector.broadcast %cst_73 : f32 to vector<8x1xf32>
    %151 = arith.divf %149, %150 : vector<8x1xf32>
    %152 = vector.broadcast %151 : vector<8x1xf32> to vector<8x32xf32>
    %153 = arith.subf %147, %152 : vector<8x32xf32>
    %154 = arith.mulf %153, %153 : vector<8x32xf32>
    %cst_74 = arith.constant dense<0.000000e+00> : vector<8xf32>
    %155 = vector.multi_reduction <add>, %154, %cst_74 [1] : vector<8x32xf32> to vector<8xf32>
    %156 = vector.shape_cast %155 : vector<8xf32> to vector<8x1xf32>
    %cst_75 = arith.constant 3.200000e+01 : f32
    %157 = vector.broadcast %cst_75 : f32 to vector<8x1xf32>
    %158 = arith.divf %156, %157 : vector<8x1xf32>
    %cst_76 = arith.constant 9.99999974E-6 : f32
    %159 = vector.broadcast %cst_76 : f32 to vector<8x1xf32>
    %160 = arith.addf %158, %159 : vector<8x1xf32>
    %161 = math.rsqrt %160 : vector<8x1xf32>
    %162 = vector.broadcast %161 : vector<8x1xf32> to vector<8x32xf32>
    %163 = arith.mulf %153, %162 : vector<8x32xf32>
    %c16 = arith.constant 16 : index
    %c0_77 = arith.constant 0 : index
    %164 = vector.load %arg15[%c16, %c0_77] : memref<22x128xf32, #tpu.memory_space<vmem>>, vector<1x32xf32>
    %165 = vector.broadcast %164 : vector<1x32xf32> to vector<8x32xf32>
    %166 = arith.mulf %163, %165 : vector<8x32xf32>
    %c17 = arith.constant 17 : index
    %c0_78 = arith.constant 0 : index
    %167 = vector.load %arg15[%c17, %c0_78] : memref<22x128xf32, #tpu.memory_space<vmem>>, vector<1x32xf32>
    %168 = vector.broadcast %167 : vector<1x32xf32> to vector<8x32xf32>
    %169 = arith.addf %166, %168 : vector<8x32xf32>
    %cst_79 = arith.constant 0.000000e+00 : f32
    %170 = vector.broadcast %cst_79 : f32 to vector<8x32xf32>
    %171 = arith.maximumf %169, %170 : vector<8x32xf32>
    %172 = arith.truncf %171 : vector<8x32xf32> to vector<8x32xbf16>
    %c0_80 = arith.constant 0 : index
    %c0_81 = arith.constant 0 : index
    %173 = vector.load %arg13[%c0_80, %c0_81] : memref<32x128xbf16, #tpu.memory_space<vmem>>, vector<32x128xbf16>
    %cst_82 = arith.constant dense<0.000000e+00> : vector<8x128xf32>
    %174 = tpu.matmul %172, %173, %cst_82 {dimension_numbers = #tpu.dot_dimension_numbers<[1], [0], [0], [1], [0, 0, 1, 1], [], []>} : vector<8x32xbf16>, vector<32x128xbf16>, vector<8x128xf32> -> vector<8x128xf32>
    %c18 = arith.constant 18 : index
    %c0_83 = arith.constant 0 : index
    %175 = vector.load %arg15[%c18, %c0_83] : memref<22x128xf32, #tpu.memory_space<vmem>>, vector<1x128xf32>
    %176 = vector.broadcast %175 : vector<1x128xf32> to vector<8x128xf32>
    %177 = arith.addf %174, %176 : vector<8x128xf32>
    %178 = arith.addf %141, %177 : vector<8x128xf32>
    %179 = arith.truncf %178 : vector<8x128xf32> to vector<8x128xbf16>
    %c0_84 = arith.constant 0 : index
    %c0_85 = arith.constant 0 : index
    %180 = vector.load %arg14[%c0_84, %c0_85] : memref<128x64xbf16, #tpu.memory_space<vmem>>, vector<128x64xbf16>
    %cst_86 = arith.constant dense<0.000000e+00> : vector<8x64xf32>
    %181 = tpu.matmul %179, %180, %cst_86 {dimension_numbers = #tpu.dot_dimension_numbers<[1], [0], [0], [1], [0, 0, 1, 1], [], []>} : vector<8x128xbf16>, vector<128x64xbf16>, vector<8x64xf32> -> vector<8x64xf32>
    %c19 = arith.constant 19 : index
    %c0_87 = arith.constant 0 : index
    %182 = vector.load %arg15[%c19, %c0_87] : memref<22x128xf32, #tpu.memory_space<vmem>>, vector<1x64xf32>
    %183 = vector.broadcast %182 : vector<1x64xf32> to vector<8x64xf32>
    %184 = arith.addf %181, %183 : vector<8x64xf32>
    %cst_88 = arith.constant dense<0.000000e+00> : vector<8xf32>
    %185 = vector.multi_reduction <add>, %184, %cst_88 [1] : vector<8x64xf32> to vector<8xf32>
    %186 = vector.shape_cast %185 : vector<8xf32> to vector<8x1xf32>
    %cst_89 = arith.constant 6.400000e+01 : f32
    %187 = vector.broadcast %cst_89 : f32 to vector<8x1xf32>
    %188 = arith.divf %186, %187 : vector<8x1xf32>
    %189 = vector.broadcast %188 : vector<8x1xf32> to vector<8x64xf32>
    %190 = arith.subf %184, %189 : vector<8x64xf32>
    %191 = arith.mulf %190, %190 : vector<8x64xf32>
    %cst_90 = arith.constant dense<0.000000e+00> : vector<8xf32>
    %192 = vector.multi_reduction <add>, %191, %cst_90 [1] : vector<8x64xf32> to vector<8xf32>
    %193 = vector.shape_cast %192 : vector<8xf32> to vector<8x1xf32>
    %cst_91 = arith.constant 6.400000e+01 : f32
    %194 = vector.broadcast %cst_91 : f32 to vector<8x1xf32>
    %195 = arith.divf %193, %194 : vector<8x1xf32>
    %cst_92 = arith.constant 9.99999974E-6 : f32
    %196 = vector.broadcast %cst_92 : f32 to vector<8x1xf32>
    %197 = arith.addf %195, %196 : vector<8x1xf32>
    %198 = math.rsqrt %197 : vector<8x1xf32>
    %199 = vector.broadcast %198 : vector<8x1xf32> to vector<8x64xf32>
    %200 = arith.mulf %190, %199 : vector<8x64xf32>
    %c20 = arith.constant 20 : index
    %c0_93 = arith.constant 0 : index
    %201 = vector.load %arg15[%c20, %c0_93] : memref<22x128xf32, #tpu.memory_space<vmem>>, vector<1x64xf32>
    %202 = vector.broadcast %201 : vector<1x64xf32> to vector<8x64xf32>
    %203 = arith.mulf %200, %202 : vector<8x64xf32>
    %c21 = arith.constant 21 : index
    %c0_94 = arith.constant 0 : index
    %204 = vector.load %arg15[%c21, %c0_94] : memref<22x128xf32, #tpu.memory_space<vmem>>, vector<1x64xf32>
    %205 = vector.broadcast %204 : vector<1x64xf32> to vector<8x64xf32>
    %206 = arith.addf %203, %205 : vector<8x64xf32>
    %cst_95 = arith.constant 0.000000e+00 : f32
    %207 = vector.broadcast %cst_95 : f32 to vector<8x64xf32>
    %208 = arith.maximumf %206, %207 : vector<8x64xf32>
    %c0_96 = arith.constant 0 : index
    %c0_97 = arith.constant 0 : index
    %209 = vector.load %arg16[%c0_96, %c0_97] : memref<8x64xf32, #tpu.memory_space<vmem>>, vector<8x64xf32>
    tpu.vector_store %arg16[%c0_96, %c0_97], %208 {strides = array<i32>} : memref<8x64xf32, #tpu.memory_space<vmem>>, vector<8x64xf32>,
    return
  }
  func.func @transform_0(%arg0: i32) -> (i32, i32) {
    %c0_i32 = arith.constant 0 : i32
    %c0_i32_0 = arith.constant 0 : i32
    return %arg0, %c0_i32 : i32, i32
  }
  func.func @transform_1(%arg0: i32) -> (i32, i32) {
    %c0_i32 = arith.constant 0 : i32
    %c0_i32_0 = arith.constant 0 : i32
    return %arg0, %c0_i32 : i32, i32
  }
  func.func @transform_2(%arg0: i32) -> (i32, i32) {
    %c0_i32 = arith.constant 0 : i32
    %c0_i32_0 = arith.constant 0 : i32
    return %arg0, %c0_i32 : i32, i32
  }
  func.func @transform_3(%arg0: i32) -> (i32, i32) {
    %c0_i32 = arith.constant 0 : i32
    %c0_i32_0 = arith.constant 0 : i32
    return %arg0, %c0_i32 : i32, i32
  }
  func.func @transform_4(%arg0: i32) -> (i32, i32) {
    %c0_i32 = arith.constant 0 : i32
    %c0_i32_0 = arith.constant 0 : i32
    %c0_i32_1 = arith.constant 0 : i32
    return %c0_i32, %c0_i32_0 : i32, i32
  }
  func.func @transform_5(%arg0: i32) -> (i32, i32) {
    %c0_i32 = arith.constant 0 : i32
    %c0_i32_0 = arith.constant 0 : i32
    %c0_i32_1 = arith.constant 0 : i32
    return %c0_i32, %c0_i32_0 : i32, i32
  }
  func.func @transform_6(%arg0: i32) -> (i32, i32) {
    %c0_i32 = arith.constant 0 : i32
    %c0_i32_0 = arith.constant 0 : i32
    %c0_i32_1 = arith.constant 0 : i32
    return %c0_i32, %c0_i32_0 : i32, i32
  }
  func.func @transform_7(%arg0: i32) -> (i32, i32) {
    %c0_i32 = arith.constant 0 : i32
    %c0_i32_0 = arith.constant 0 : i32
    %c0_i32_1 = arith.constant 0 : i32
    return %c0_i32, %c0_i32_0 : i32, i32
  }
  func.func @transform_8(%arg0: i32) -> (i32, i32) {
    %c0_i32 = arith.constant 0 : i32
    %c0_i32_0 = arith.constant 0 : i32
    %c0_i32_1 = arith.constant 0 : i32
    return %c0_i32, %c0_i32_0 : i32, i32
  }
  func.func @transform_9(%arg0: i32) -> (i32, i32) {
    %c0_i32 = arith.constant 0 : i32
    %c0_i32_0 = arith.constant 0 : i32
    %c0_i32_1 = arith.constant 0 : i32
    return %c0_i32, %c0_i32_0 : i32, i32
  }
  func.func @transform_10(%arg0: i32) -> (i32, i32) {
    %c0_i32 = arith.constant 0 : i32
    %c0_i32_0 = arith.constant 0 : i32
    %c0_i32_1 = arith.constant 0 : i32
    return %c0_i32, %c0_i32_0 : i32, i32
  }
  func.func @transform_11(%arg0: i32) -> (i32, i32) {
    %c0_i32 = arith.constant 0 : i32
    %c0_i32_0 = arith.constant 0 : i32
    %c0_i32_1 = arith.constant 0 : i32
    return %c0_i32, %c0_i32_0 : i32, i32
  }
  func.func @transform_12(%arg0: i32) -> (i32, i32) {
    %c0_i32 = arith.constant 0 : i32
    %c0_i32_0 = arith.constant 0 : i32
    %c0_i32_1 = arith.constant 0 : i32
    return %c0_i32, %c0_i32_0 : i32, i32
  }
  func.func @transform_13(%arg0: i32) -> (i32, i32) {
    %c0_i32 = arith.constant 0 : i32
    %c0_i32_0 = arith.constant 0 : i32
    %c0_i32_1 = arith.constant 0 : i32
    return %c0_i32, %c0_i32_0 : i32, i32
  }
  func.func @transform_14(%arg0: i32) -> (i32, i32) {
    %c0_i32 = arith.constant 0 : i32
    %c0_i32_0 = arith.constant 0 : i32
    %c0_i32_1 = arith.constant 0 : i32
    return %c0_i32, %c0_i32_0 : i32, i32
  }
  func.func @transform_15(%arg0: i32) -> (i32, i32) {
    %c0_i32 = arith.constant 0 : i32
    %c0_i32_0 = arith.constant 0 : i32
    return %arg0, %c0_i32 : i32, i32
  }
}

</mosaic_0001>

<bundles_post_ra>
// kernel: tpu_custom_call.1
= control target key start
LH: loop header
LB: loop body
LE: loop exit
PB: predicated region body
PF: predicated region fallthrough
CT: control target
= control target key end

     0   :  { %20 = vsyncpa [#allocation3], 0  ;;  %s1895_s0 = inlined_call_operand.hbm [shape: bf16[8,64], index: 0, kind: input, shape index: {}]   ;;  %s1896_s1 = inlined_call_operand.hbm [shape: bf16[8,8], index: 1, kind: input, shape index: {}]   ;;  %s1897_s2 = inlined_call_operand.hbm [shape: bf16[8,32], index: 2, kind: input, shape index: {}]   ;;  %s1898_s3 = inlined_call_operand.hbm [shape: bf16[8,16], index: 3, kind: input, shape index: {}]   ;;  %s1899_s4 = inlined_call_operand.vmem [shape: bf16[64,128], index: 4, kind: input, shape index: {}]   ;;  %s1900_s5 = inlined_call_operand.vmem [shape: bf16[128,64], index: 5, kind: input, shape index: {}]   ;;  %s1901_s6 = inlined_call_operand.vmem [shape: bf16[64,128], index: 6, kind: input, shape index: {}]   ;;  %s1902_s7 = inlined_call_operand.hbm [shape: bf16[8,64], index: 7, kind: input, shape index: {}]   ;;  %s1903_s8 = inlined_call_operand.vmem [shape: bf16[64,128], index: 8, kind: input, shape index: {}]   ;;  %s1904_s9 = inlined_call_operand.vmem [shape: bf16[32,64], index: 9, kind: input, shape index: {}]   ;;  %s1905_s10 = inlined_call_operand.vmem [shape: bf16[64,128], index: 10, kind: input, shape index: {}]   ;;  %s1906_s11 = inlined_call_operand.vmem [shape: bf16[16,32], index: 11, kind: input, shape index: {}]   ;;  %s1907_s12 = inlined_call_operand.hbm [shape: bf16[32,128], index: 12, kind: input, shape index: {}]   ;;  %s1908_s13 = inlined_call_operand.vmem [shape: bf16[128,64], index: 13, kind: input, shape index: {}]   ;;  %s1909_s14 = inlined_call_operand.vmem [shape: f32[22,128], index: 14, kind: input, shape index: {}]   ;;  %s1910_s15 = inlined_call_operand.hbm [shape: f32[8,64], index: 15, kind: output, shape index: {}]  }
   0x1   :  { %21 = vsyncpa [#allocation6], 0 }
   0x2   :  { %22 = vsyncpa [#allocation9], 0 }
   0x3   :  { %23 = vsyncpa [#allocation12], 0 }
   0x4   :  { %24 = vsyncpa [#allocation4], 0  ;;  %s1534_s18 = smov [#allocation5]   ;;  %s1535_s20 = smov [#allocation8]  }
   0x5   :  { %s41_s19 = sshll.u32 %s1534_s18, 4  ;;  %s61_s21 = sshll.u32 %s1535_s20, 4  ;;  %s42_s19 = int_to_ptr.vmem [resolvable:$true] %s41_s19  ;;  %s62_s21 = int_to_ptr.vmem [resolvable:$true] %s61_s21 }
   0x6   :  { %s1392_s22 = scalar_lea.vmem %s42_s19, 64  ;;  %p1397_p1 = scmp.lt.s32.totalorder %s42_s19, %s42_s19 }
   0x7   :  { %p1393_p0 = scmp.ne.s32.totalorder %s42_s19, %s1392_s22  ;;  %p1398_p2 = scmp.lt.s32.totalorder %s1392_s22, %s1392_s22 }
   0x9   :  { %p1399_p3 = por %p1398_p2, %p1397_p1 }
   0xb   :  { %p1400_p4 = pnand %p1399_p3, %p1393_p0 }
   0xd   :  { %1403 = shalt.err (!%p1400_p4)
}
   0xe   :  { %44 = dma.hbm_to_vmem [thread:$0]  %s1896_s1, 64, %s42_s19, [#allocation6]  }
   0xf   :  { %s1412_s25 = scalar_lea.vmem %s62_s21, 64  ;;  %p1417_p6 = scmp.lt.s32.totalorder %s62_s21, %s62_s21 }
  0x10   :  { %p1413_p5 = scmp.ne.s32.totalorder %s62_s21, %s1412_s25  ;;  %p1418_p7 = scmp.lt.s32.totalorder %s1412_s25, %s1412_s25 }
  0x12   :  { %p1419_p8 = por %p1418_p7, %p1417_p6 }
  0x14   :  { %p1420_p9 = pnand %p1419_p8, %p1413_p5 }
  0x16   :  { %1423 = shalt.err (!%p1420_p9)
}
  0x17   :  { %64 = dma.hbm_to_vmem [thread:$0]  %s1898_s3, 64, %s62_s21, [#allocation9]  }
  0x18   :  { %s1536_s28 = smov [#allocation2]   ;;  %s1537_s30 = smov [#allocation7]  }
  0x19   :  { %s31_s29 = sshll.u32 %s1536_s28, 4  ;;  %s51_s16 = sshll.u32 %s1537_s30, 4  ;;  %s32_s29 = int_to_ptr.vmem [resolvable:$true] %s31_s29  ;;  %s52_s16 = int_to_ptr.vmem [resolvable:$true] %s51_s16 }
  0x1a   :  { %s1432_s17 = scalar_lea.vmem %s32_s29, 64  ;;  %p1437_p11 = scmp.lt.s32.totalorder %s32_s29, %s32_s29 }
  0x1b   :  { %p1433_p10 = scmp.ne.s32.totalorder %s32_s29, %s1432_s17  ;;  %p1438_p12 = scmp.lt.s32.totalorder %s1432_s17, %s1432_s17 }
  0x1d   :  { %p1439_p13 = por %p1438_p12, %p1437_p11 }
  0x1f   :  { %p1440_p0 = pnand %p1439_p13, %p1433_p10 }
  0x21   :  { %1443 = shalt.err (!%p1440_p0)
}
  0x22   :  { %34 = dma.hbm_to_vmem [thread:$0]  %s1895_s0, 64, %s32_s29, [#allocation3]  }
  0x23   :  { %s1452_s19 = scalar_lea.vmem %s52_s16, 64  ;;  %p1457_p2 = scmp.lt.s32.totalorder %s52_s16, %s52_s16 }
  0x24   :  { %p1453_p1 = scmp.ne.s32.totalorder %s52_s16, %s1452_s19  ;;  %p1458_p3 = scmp.lt.s32.totalorder %s1452_s19, %s1452_s19 }
  0x26   :  { %p1459_p4 = por %p1458_p3, %p1457_p2 }
  0x28   :  { %p1460_p5 = pnand %p1459_p4, %p1453_p1 }
  0x2a   :  { %1463 = shalt.err (!%p1460_p5)
}
  0x2b   :  { %54 = dma.hbm_to_vmem [thread:$0]  %s1897_s2, 64, %s52_s16, [#allocation6]  }
  0x2c   :  { %s1538_s21 = smov [#allocation10]   ;;  %s1539_s23 = smov [#allocation11]  }
  0x2d   :  { %s77_s22 = sshll.u32 %s1538_s21, 4  ;;  %s94_s24 = sshll.u32 %s1539_s23, 4  ;;  %s78_s22 = int_to_ptr.vmem [resolvable:$true] %s77_s22  ;;  %s95_s24 = int_to_ptr.vmem [resolvable:$true] %s94_s24 }
  0x2e   :  { %s1472_s25 = scalar_lea.vmem %s78_s22, 64  ;;  %p1477_p7 = scmp.lt.s32.totalorder %s78_s22, %s78_s22 }
  0x2f   :  { %p1473_p6 = scmp.ne.s32.totalorder %s78_s22, %s1472_s25  ;;  %p1478_p8 = scmp.lt.s32.totalorder %s1472_s25, %s1472_s25 }
  0x31   :  { %p1479_p9 = por %p1478_p8, %p1477_p7 }
  0x33   :  { %p1480_p10 = pnand %p1479_p9, %p1473_p6 }
  0x35   :  { %1483 = shalt.err (!%p1480_p10)
}
  0x36   :  { %80 = dma.hbm_to_vmem [thread:$0]  %s1902_s7, 64, %s78_s22, [#allocation9]  }
  0x37   :  { %s1492_s27 = scalar_lea.vmem %s95_s24, 256  ;;  %p1497_p12 = scmp.lt.s32.totalorder %s95_s24, %s95_s24 }
  0x38   :  { %p1493_p11 = scmp.ne.s32.totalorder %s95_s24, %s1492_s27  ;;  %p1498_p13 = scmp.lt.s32.totalorder %s1492_s27, %s1492_s27 }
  0x3a   :  { %p1499_p0 = por %p1498_p13, %p1497_p12 }
  0x3c   :  { %p1500_p1 = pnand %p1499_p0, %p1493_p11 }
  0x3e   :  { %1503 = shalt.err (!%p1500_p1)
}
  0x3f   :  { %s1540_s2 = smov 64   ;;  %s1541_s28 = smov 4  }
  0x40   :  { %100 = dma.hbm_to_vmem [thread:$0]  %s1907_s12, 256, %s95_s24, [#allocation12], %s1540_s2, %s1540_s2, %s1541_s28  }
  0x41   :  { %1524 = dma.done.wait [#allocation3], 64  }
  0x42   :  { %1525 = vsyncadd [#allocation3], 4294967232 }
  0x43   :  { %1526 = dma.done.wait [#allocation6], 128  }
  0x44   :  { %1527 = vsyncadd [#allocation6], 4294967168 }
  0x45   :  { %1528 = dma.done.wait [#allocation9], 128  }
  0x46   :  { %1529 = vsyncadd [#allocation9], 4294967168 }
  0x47   :  { %1530 = dma.done.wait [#allocation12], 256  }
  0x48   :  { %1531 = vsyncadd [#allocation12], 4294967040  ;;  %v1542_v0 = vmov 0.0   ;;  %vm1543_vm0 = vmmov 0   ;;  %v1335_v1 = vld [vmem:[%s1899_s4 + $0x18] sm:$0xff]   ;;  %v1336_v2 = vld [vmem:[%s1899_s4 + $0x10] sm:$0xff]  }
  0x49   :  { %1208 = vmatprep.subr.bf16.mxu1 %v1542_v0  ;;  %1216 = vmatprep.mubr.msk.bf16.mxu1 %vm1543_vm0, %v1542_v0  ;;  %v1337_v3 = vld [vmem:[%s1899_s4 + $0x8] sm:$0xff]   ;;  %vm162_vm1 = vcmask 523264   ;;  %v1338_v4 = vld [vmem:[%s1899_s4] sm:$0xff]   ;;  %v1339_v12 = vld [vmem:[%s1900_s5 + $0x38] sm:$0xff]   ;;  %vm460_vm2 = vcmask 1043456   ;;  %vm456_vm3 = vcmask 64512  }
  0x4a   :  { %1240 = vmatprep.subr.bf16.mxu0 %v1542_v0  ;;  %1248 = vmatprep.mubr.msk.bf16.mxu0 %vm1543_vm0, %v1542_v0  ;;  %v124_v5 = vld [vmem:[#allocation2] sm:$0xf]  ;;  %v1340_v17 = vld [vmem:[%s1900_s5 + $0x30] sm:$0xff]   ;;  %v1341_v18 = vld [vmem:[%s1900_s5 + $0x28] sm:$0xff]   ;;  %vm635_vm4 = vcmask 261120   ;;  %vm801_vm5 = vcmask 130048  }
  0x4b   :  { %1209 = vmatpush3.bf16.msra.mxu1 %v1335_v1  ;;  %v1093_v6 = vld [vmem:[%s1909_s14] ss:$0 sm:$0xff]  ;;  %v1343_v20 = vld [vmem:[%s1900_s5 + $0x18] sm:$0xff]   ;;  %v1344_v21 = vld [vmem:[%s1900_s5 + $0x10] sm:$0xff]   ;;  %s1544_s21 = smov [#allocation13]  }
  0x4c   :  { %1210 = vmatprep.subr.bf16.mxu1 %v1542_v0  ;;  %v1342_v19 = vld [vmem:[%s1900_s5 + $0x20] sm:$0xff]   ;;  %v1345_v22 = vld [vmem:[%s1900_s5 + $0x8] sm:$0xff]   ;;  %v1347_v47 = vld [vmem:[%s1901_s6 + $0x18] sm:$0xff]   ;;  %s1081_s4 = sshll.u32 %s1544_s21, 4  ;;  %s1082_s4 = int_to_ptr.vmem [resolvable:$true] %s1081_s4 }
  0x4d   :  { %v1346_v23 = vld [vmem:[%s1900_s5] sm:$0xff]   ;;  %1241 = vmatpush3.bf16.msra.mxu0 %v1347_v47  ;;  %v1348_v48 = vld [vmem:[%s1901_s6 + $0x10] sm:$0xff]   ;;  %v1349_v49 = vld [vmem:[%s1901_s6 + $0x8] sm:$0xff]   ;;  %s1504_s22 = scalar_lea.vmem %s1082_s4, 128  ;;  %p1509_p3 = scmp.lt.s32.totalorder %s1082_s4, %s1082_s4 }
  0x4e   :  { %v1099_v28 = vld [vmem:[%s1909_s14 + $0x1] ss:$0 sm:$0xff]  ;;  %v1100_v30 = vld [vmem:[%s1909_s14 + $0x2] ss:$0 sm:$0xff]  ;;  %v1101_v35 = vld [vmem:[%s1909_s14 + $0x3] ss:$0 sm:$0xff]  ;;  %1242 = vmatprep.subr.bf16.mxu0 %v1542_v0  ;;  %p1505_p2 = scmp.ne.s32.totalorder %s1082_s4, %s1504_s22  ;;  %p1510_p4 = scmp.lt.s32.totalorder %s1504_s22, %s1504_s22 }
  0x4f   :  { %1211 = vmatpush3.bf16.msra.mxu1 %v1336_v2  ;;  %v1350_v50 = vld [vmem:[%s1901_s6] sm:$0xff]   ;;  %v450_v60 = vld [vmem:[#allocation10] sm:$0xf]  ;;  %v1351_v2 = vld [vmem:[%s1904_s9 + $0x8] sm:$0xff]  }
  0x50   :  { %1212 = vmatprep.subr.bf16.mxu1 %v1542_v0  ;;  %v1110_v55 = vld [vmem:[%s1909_s14 + $0x4] ss:$0 sm:$0xff]  ;;  %v1111_v57 = vld [vmem:[%s1909_s14 + $0x5] ss:$0 sm:$0xff]  ;;  %v462_v63 = vsel %vm460_vm2, %v450_v60, 0  ;;  %p1511_p5 = por %p1510_p4, %p1509_p3 }
  0x51   :  { %1243 = vmatpush3.bf16.msra.mxu0 %v1348_v48  ;;  %v449_v1 = vld [vmem:[#allocation5] sm:$0xf]  ;;  %v1120_v48 = vld [vmem:[%s1909_s14 + $0x8] ss:$0 sm:$0xff] }
  0x52   :  { %1244 = vmatprep.subr.bf16.mxu0 %v1542_v0  ;;  %p1512_p6 = pnand %p1511_p5, %p1505_p2 }
  0x53   :  { %1213 = vmatpush3.bf16.msra.mxu1 %v1337_v3  ;;  %v1352_v3 = vld [vmem:[%s1904_s9] sm:$0xff]  }
  0x54   :  { %1214 = vmatprep.subr.bf16.mxu1 %v1542_v0 }
  0x55   :  { %1245 = vmatpush3.bf16.msra.mxu0 %v1349_v49 }
  0x56   :  { %1246 = vmatprep.subr.bf16.mxu0 %v1542_v0 }
  0x57   :  { %1215 = vmatpush3.bf16.msra.mxu1 %v1338_v4  ;;  %v613_v4 = vld [vmem:[#allocation7] sm:$0xf] }
  0x58   :  { %1220 = vmatprep.subr.bf16.mxu1 %v1542_v0 }
  0x59   :  { %1247 = vmatpush3.bf16.msra.mxu0 %v1350_v50  ;;  %v1121_v50 = vld [vmem:[%s1909_s14 + $0x9] ss:$0 sm:$0xff] }
  0x5a   :  { %1217 = vmatmul.mubr.msk.bf16.vlgmr.msra.gmra.mxu1 %vm162_vm1, %v124_v5  ;;  %1252 = vmatprep.subr.bf16.mxu0 %v1542_v0 }
  0x5b   :  { %1236 = vmatprep.mubr.msk.bf16.mxu1 %vm1543_vm0, %v1542_v0  ;;  %1221 = vmatpush3.bf16.msra.mxu1 %v1339_v12 }
  0x5c   :  { %1222 = vmatprep.subr.bf16.mxu1 %v1542_v0 }
  0x5f   :  { %1223 = vmatpush3.bf16.msra.mxu1 %v1340_v17 }
  0x60   :  { %1224 = vmatprep.subr.bf16.mxu1 %v1542_v0 }
  0x63   :  { %1225 = vmatpush3.bf16.msra.mxu1 %v1341_v18 }
  0x64   :  { %1226 = vmatprep.subr.bf16.mxu1 %v1542_v0 }
  0x67   :  { %1227 = vmatpush3.bf16.msra.mxu1 %v1342_v19 }
  0x68   :  { %1228 = vmatprep.subr.bf16.mxu1 %v1542_v0 }
  0x6b   :  { %1229 = vmatpush3.bf16.msra.mxu1 %v1343_v20 }
  0x6c   :  { %1230 = vmatprep.subr.bf16.mxu1 %v1542_v0 }
  0x6f   :  { %1231 = vmatpush3.bf16.msra.mxu1 %v1344_v21 }
  0x70   :  { %1232 = vmatprep.subr.bf16.mxu1 %v1542_v0 }
  0x73   :  { %1233 = vmatpush3.bf16.msra.mxu1 %v1345_v22 }
  0x74   :  { %1234 = vmatprep.subr.bf16.mxu1 %v1542_v0 }
  0x77   :  { %1235 = vmatpush3.bf16.msra.mxu1 %v1346_v23 }
  0x78   :  { %1258 = vmatprep.subr.bf16.mxu1 %v1542_v0 }
 0x11a   :  { %v200_v7 = vpop.f32.mrf.mxu1 }
 0x11b   :  { %v201_v8 = vadd.f32 %v1093_v6, %v200_v7 }
 0x11c   :  { %v1218_v9 = vpop.f32.mrf.mxu1 }
 0x11d   :  { %206 = vadd.xlane.f32.xlu0 %v201_v8  ;;  %v1118_v9 = vld [vmem:[%s1909_s14 + $0x7] ss:$0 sm:$0xff] }
 0x11e   :  { %v203_v10 = vpop.f32.mrf.mxu1 }
 0x120   :  { %v1219_v11 = vpop.f32.mrf.mxu1 }
 0x1a6   :  { %v207_v13 = vpop.xlane.xlu0 %206 }
 0x1a7   :  { %v209_v14 = vmul.f32 0.0078125, %v207_v13 }
 0x1a9   :  { %v210_v15 = vsub.f32 %v201_v8, %v209_v14 }
 0x1ab   :  { %v211_v16 = vmul.f32 %v210_v15, %v210_v15 }
 0x1ad   :  { %212 = vadd.xlane.f32.xlu0 %v211_v16  ;;  %v1128_v16 = vld [vmem:[%s1909_s14 + $0xb] ss:$0 sm:$0xff] }
 0x236   :  { %v213_v24 = vpop.xlane.xlu0 %212 }
 0x237   :  { %v214_v25 = vmul.f32 0.0078125, %v213_v24 }
 0x239   :  { %v215_v26 = vadd.f32 1e-05, %v214_v25 }
 0x23b   :  { %1372 = vrsqrt.f32 %v215_v26 }
 0x248   :  { %v1373_v27 = vpop.eup %1372 }
 0x249   :  { %v217_v29 = vmul.f32 %v1373_v27, %v210_v15 }
 0x24b   :  { %v223_v31 = vmul.f32 %v1099_v28, %v217_v29 }
 0x24d   :  { %v229_v32 = vadd.f32 %v1100_v30, %v223_v31 }
 0x24f   :  { %v230_v33 = vmax.f32 %v229_v32, 0.0 }
 0x251   :  { %v231_v34 = vpack.c.bf16 %v230_v33, %v230_v33  ;;  %v1353_v33 = vld [vmem:[%s1903_s8 + $0x18] sm:$0xff]  }
 0x253   :  { %1237 = vmatmul.mubr.bf16.vlgmr.msra.gmra.mxu1 %v231_v34  ;;  %v1354_v34 = vld [vmem:[%s1903_s8 + $0x10] sm:$0xff]  }
 0x254   :  { %1266 = vmatprep.mubr.msk.bf16.mxu1 %vm1543_vm0, %v1542_v0  ;;  %1259 = vmatpush3.bf16.msra.mxu1 %v1353_v33  ;;  %v1364_v33 = vld [vmem:[%s1908_s13 + $0x38] sm:$0xff]  }
 0x255   :  { %1260 = vmatprep.subr.bf16.mxu1 %v1542_v0 }
 0x258   :  { %1261 = vmatpush3.bf16.msra.mxu1 %v1354_v34  ;;  %v1365_v34 = vld [vmem:[%s1908_s13 + $0x30] sm:$0xff]  }
 0x259   :  { %1262 = vmatprep.subr.bf16.mxu1 %v1542_v0 }
 0x313   :  { %v335_v36 = vpop.f32.mrf.mxu1 }
 0x314   :  { %v336_v37 = vadd.f32 %v1101_v35, %v335_v36  ;;  %v1355_v35 = vld [vmem:[%s1903_s8 + $0x8] sm:$0xff]   ;;  %v1356_v36 = vld [vmem:[%s1905_s10 + $0x18] sm:$0xff]  }
 0x315   :  { %v1238_v38 = vpop.f32.mrf.mxu1  ;;  %1263 = vmatpush3.bf16.msra.mxu1 %v1355_v35  ;;  %v1366_v35 = vld [vmem:[%s1908_s13 + $0x28] sm:$0xff]  }
 0x316   :  { %v341_v39 = vsel %vm162_vm1, %v336_v37, 0.0  ;;  %1264 = vmatprep.subr.bf16.mxu1 %v1542_v0  ;;  %v1358_v38 = vld [vmem:[%s1905_s10 + $0x10] sm:$0xff]  }
 0x317   :  { %342 = vadd.xlane.f32.xlu1 %v341_v39  ;;  %v338_v40 = vpop.f32.mrf.mxu1  ;;  %v1360_v39 = vld [vmem:[%s1905_s10 + $0x8] sm:$0xff]  }
 0x318   :  { %v1361_v40 = vld [vmem:[%s1905_s10] sm:$0xff]  }
 0x319   :  { %v1239_v41 = vpop.f32.mrf.mxu1 }
 0x3a0   :  { %v343_v42 = vpop.xlane.xlu1 %342 }
 0x3a1   :  { %v345_v43 = vmul.f32 0.015625, %v343_v42 }
 0x3a3   :  { %v346_v44 = vsub.f32 %v336_v37, %v345_v43  ;;  %v1357_v37 = vld [vmem:[%s1903_s8] sm:$0xff]  }
 0x3a4   :  { %1265 = vmatpush3.bf16.msra.mxu1 %v1357_v37  ;;  %v1368_v37 = vld [vmem:[%s1908_s13 + $0x18] sm:$0xff]  }
 0x3a5   :  { %v347_v45 = vmul.f32 %v346_v44, %v346_v44  ;;  %1290 = vmatprep.subr.bf16.mxu1 %v1542_v0 }
 0x3a7   :  { %v348_v46 = vsel %vm162_vm1, %v347_v45, 0.0 }
 0x3a8   :  { %349 = vadd.xlane.f32.xlu1 %v348_v46 }
 0x431   :  { %v350_v51 = vpop.xlane.xlu1 %349 }
 0x432   :  { %v351_v52 = vmul.f32 0.015625, %v350_v51 }
 0x434   :  { %v352_v53 = vadd.f32 1e-05, %v351_v52 }
 0x436   :  { %1374 = vrsqrt.f32 %v352_v53 }
 0x443   :  { %v1375_v54 = vpop.eup %1374 }
 0x444   :  { %v354_v56 = vmul.f32 %v1375_v54, %v346_v44 }
 0x446   :  { %v360_v58 = vmul.f32 %v1110_v55, %v354_v56  ;;  %v1359_v55 = vld [vmem:[%s1906_s11] sm:$0xff]   ;;  %v1132_v56 = vld [vmem:[%s1909_s14 + $0xc] ss:$0 sm:$0xff] }
 0x448   :  { %v366_v59 = vadd.f32 %v1111_v57, %v360_v58 }
 0x44a   :  { %v367_v61 = vmax.f32 %v366_v59, 0.0  ;;  %v1133_v59 = vld [vmem:[%s1909_s14 + $0xd] ss:$0 sm:$0xff] }
 0x44c   :  { %v368_v62 = vpack.c.bf16 %v367_v61, %v367_v61 }
 0x44e   :  { %1249 = vmatmul.mubr.msk.bf16.vlgmr.msra.gmra.mxu0 %vm162_vm1, %v368_v62 }
 0x44f   :  { %1253 = vmatpush3.bf16.msra.mxu0 %v462_v63  ;;  %1254 = vmatprep.mubr.msk.bf16.mxu0 %vm1543_vm0, %v1542_v0  ;;  %v787_v63 = vld [vmem:[#allocation8] sm:$0xf] }
 0x450   :  { %1270 = vmatprep.subr.bf16.mxu0 %v1542_v0 }
 0x456   :  { %1255 = vmatmul.mubr.msk.bf16.vlgmr.msra.gmra.mxu0 %vm456_vm3, %v449_v1 }
 0x457   :  { %1271 = vmatpush3.bf16.msra.mxu0 %v1351_v2  ;;  %1274 = vmatprep.mubr.msk.bf16.mxu0 %vm1543_vm0, %v1542_v0  ;;  %v1122_v2 = vld [vmem:[%s1909_s14 + $0xa] ss:$0 sm:$0xff] }
 0x458   :  { %1272 = vmatprep.subr.bf16.mxu0 %v1542_v0 }
 0x45b   :  { %1273 = vmatpush3.bf16.msra.mxu0 %v1352_v3  ;;  %v1112_v3 = vld [vmem:[%s1909_s14 + $0x6] ss:$0 sm:$0xff] }
 0x45c   :  { %1278 = vmatprep.subr.bf16.mxu0 %v1542_v0 }
 0x45e   :  { %1275 = vmatmul.mubr.msk.bf16.vlgmr.msra.gmra.mxu0 %vm635_vm4, %v613_v4 }
 0x45f   :  { %1286 = vmatprep.mubr.msk.bf16.mxu0 %vm1543_vm0, %v1542_v0  ;;  %1279 = vmatpush3.bf16.msra.mxu0 %v1356_v36  ;;  %v1367_v36 = vld [vmem:[%s1908_s13 + $0x20] sm:$0xff]  }
 0x460   :  { %1280 = vmatprep.subr.bf16.mxu0 %v1542_v0 }
 0x463   :  { %1281 = vmatpush3.bf16.msra.mxu0 %v1358_v38  ;;  %v1369_v38 = vld [vmem:[%s1908_s13 + $0x10] sm:$0xff]  }
 0x464   :  { %1282 = vmatprep.subr.bf16.mxu0 %v1542_v0 }
 0x467   :  { %1283 = vmatpush3.bf16.msra.mxu0 %v1360_v39 }
 0x468   :  { %1284 = vmatprep.subr.bf16.mxu0 %v1542_v0 }
 0x46b   :  { %1285 = vmatpush3.bf16.msra.mxu0 %v1361_v40 }
 0x46c   :  { %1304 = vmatprep.subr.bf16.mxu0 %v1542_v0 }
 0x50e   :  { %v1755_v5 = vpop.f32.mrf.mxu0 }
 0x510   :  { %v1250_v6 = vpop.f32.mrf.mxu0 }
 0x512   :  { %v446_v7 = vpop.f32.mrf.mxu0 }
 0x514   :  { %v1251_v8 = vpop.f32.mrf.mxu0 }
 0x515   :  { %v444_v8 = vadd.f32 %v1112_v3, %v1755_v5 }
 0x516   :  { %v498_v10 = vpop.f32.mrf.mxu0 }
 0x517   :  { %v499_v11 = vadd.f32 %v1118_v9, %v498_v10 }
 0x518   :  { %v1256_v12 = vpop.f32.mrf.mxu0 }
 0x519   :  { %v504_v13 = vsel %vm162_vm1, %v499_v11, 0.0 }
 0x51a   :  { %505 = vadd.xlane.f32.xlu0 %v504_v13  ;;  %v501_v14 = vpop.f32.mrf.mxu0  ;;  %v1134_v13 = vld [vmem:[%s1909_s14 + $0xe] ss:$0 sm:$0xff] }
 0x51b   :  { %v1140_v14 = vld [vmem:[%s1909_s14 + $0xf] ss:$0 sm:$0xff] }
 0x51c   :  { %v1257_v15 = vpop.f32.mrf.mxu0 }
 0x51e   :  { %v673_v17 = vpop.f32.mrf.mxu0 }
 0x51f   :  { %v674_v18 = vadd.f32 %v1128_v16, %v673_v17 }
 0x520   :  { %v1276_v19 = vpop.f32.mrf.mxu0 }
 0x521   :  { %v679_v20 = vsel %vm162_vm1, %v674_v18, 0.0 }
 0x522   :  { %680 = vadd.xlane.f32.xlu0 %v679_v20  ;;  %v676_v21 = vpop.f32.mrf.mxu0 }
 0x524   :  { %v1277_v22 = vpop.f32.mrf.mxu0 }
 0x5a3   :  { %v506_v23 = vpop.xlane.xlu0 %505 }
 0x5a4   :  { %v507_v24 = vmul.f32 0.015625, %v506_v23 }
 0x5a6   :  { %v508_v25 = vsub.f32 %v499_v11, %v507_v24 }
 0x5a8   :  { %v509_v26 = vmul.f32 %v508_v25, %v508_v25 }
 0x5aa   :  { %v510_v27 = vsel %vm162_vm1, %v509_v26, 0.0 }
 0x5ab   :  { %511 = vadd.xlane.f32.xlu1 %v510_v27  ;;  %v681_v28 = vpop.xlane.xlu0 %680 }
 0x5ac   :  { %v682_v29 = vmul.f32 0.015625, %v681_v28 }
 0x5ae   :  { %v683_v30 = vsub.f32 %v674_v18, %v682_v29 }
 0x5b0   :  { %v684_v31 = vmul.f32 %v683_v30, %v683_v30 }
 0x5b2   :  { %v685_v32 = vsel %vm162_vm1, %v684_v31, 0.0  ;;  %v1362_v31 = vld [vmem:[#allocation11 + $0x8] sm:$0xff]  }
 0x5b3   :  { %686 = vadd.xlane.f32.xlu0 %v685_v32  ;;  %v1363_v32 = vld [vmem:[#allocation11] sm:$0xff]  }
 0x634   :  { %v512_v41 = vpop.xlane.xlu1 %511 }
 0x635   :  { %v513_v42 = vmul.f32 0.015625, %v512_v41 }
 0x637   :  { %v514_v43 = vadd.f32 1e-05, %v513_v42 }
 0x639   :  { %1376 = vrsqrt.f32 %v514_v43  ;;  %v1143_v43 = vld [vmem:[%s1909_s14 + $0x10] ss:$0 sm:$0xff] }
 0x63c   :  { %v687_v44 = vpop.xlane.xlu0 %686 }
 0x63d   :  { %v688_v45 = vmul.f32 0.015625, %v687_v44 }
 0x63f   :  { %v689_v46 = vadd.f32 1e-05, %v688_v45  ;;  %v1144_v45 = vld [vmem:[%s1909_s14 + $0x11] ss:$0 sm:$0xff] }
 0x641   :  { %1378 = vrsqrt.f32 %v689_v46 }
 0x646   :  { %v1377_v47 = vpop.eup %1376 }
 0x647   :  { %v516_v49 = vmul.f32 %v1377_v47, %v508_v25 }
 0x649   :  { %v522_v51 = vmul.f32 %v1120_v48, %v516_v49 }
 0x64b   :  { %v528_v52 = vadd.f32 %v1121_v50, %v522_v51  ;;  %v1370_v50 = vld [vmem:[%s1908_s13 + $0x8] sm:$0xff]   ;;  %v1371_v51 = vld [vmem:[%s1908_s13] sm:$0xff]  }
 0x64d   :  { %v529_v53 = vmax.f32 %v528_v52, 0.0  ;;  %v1145_v52 = vld [vmem:[%s1909_s14 + $0x12] ss:$0 sm:$0xff] }
 0x64e   :  { %v1379_v54 = vpop.eup %1378 }
 0x64f   :  { %v691_v57 = vmul.f32 %v1379_v54, %v683_v30  ;;  %v530_v58 = vpack.c.bf16 %v529_v53, %v529_v53 }
 0x651   :  { %1267 = vmatmul.mubr.msk.bf16.vlgmr.msra.gmra.mxu1 %vm162_vm1, %v530_v58  ;;  %v697_v60 = vmul.f32 %v1132_v56, %v691_v57 }
 0x652   :  { %1291 = vmatpush3.bf16.msra.mxu1 %v1359_v55  ;;  %1292 = vmatprep.mubr.msk.bf16.mxu1 %vm1543_vm0, %v1542_v0 }
 0x653   :  { %v703_v61 = vadd.f32 %v1133_v59, %v697_v60  ;;  %1296 = vmatprep.subr.bf16.mxu1 %v1542_v0 }
 0x655   :  { %v704_v62 = vmax.f32 %v703_v61, 0.0 }
 0x657   :  { %v705_v1 = vpack.c.bf16 %v704_v62, %v704_v62 }
 0x659   :  { %1287 = vmatmul.mubr.msk.bf16.vlgmr.msra.gmra.mxu0 %vm162_vm1, %v705_v1  ;;  %1293 = vmatmul.mubr.msk.bf16.vlgmr.msra.gmra.mxu1 %vm801_vm5, %v787_v63 }
 0x65a   :  { %1300 = vmatprep.mubr.msk.bf16.mxu1 %vm1543_vm0, %v1542_v0  ;;  %1320 = vmatprep.mubr.msk.bf16.mxu0 %vm1543_vm0, %v1542_v0 }
 0x65b   :  { %1297 = vmatpush3.bf16.msra.mxu1 %v1362_v31  ;;  %1305 = vmatpush3.bf16.msra.mxu0 %v1364_v33 }
 0x65c   :  { %1298 = vmatprep.subr.bf16.mxu1 %v1542_v0  ;;  %1306 = vmatprep.subr.bf16.mxu0 %v1542_v0 }
 0x65f   :  { %1299 = vmatpush3.bf16.msra.mxu1 %v1363_v32  ;;  %1307 = vmatpush3.bf16.msra.mxu0 %v1365_v34 }
 0x660   :  { %1308 = vmatprep.subr.bf16.mxu0 %v1542_v0 }
 0x663   :  { %1309 = vmatpush3.bf16.msra.mxu0 %v1366_v35 }
 0x664   :  { %1310 = vmatprep.subr.bf16.mxu0 %v1542_v0 }
 0x667   :  { %1311 = vmatpush3.bf16.msra.mxu0 %v1367_v36 }
 0x668   :  { %1312 = vmatprep.subr.bf16.mxu0 %v1542_v0 }
 0x66b   :  { %1313 = vmatpush3.bf16.msra.mxu0 %v1368_v37 }
 0x66c   :  { %1314 = vmatprep.subr.bf16.mxu0 %v1542_v0 }
 0x66f   :  { %1315 = vmatpush3.bf16.msra.mxu0 %v1369_v38 }
 0x670   :  { %1316 = vmatprep.subr.bf16.mxu0 %v1542_v0 }
 0x673   :  { %1317 = vmatpush3.bf16.msra.mxu0 %v1370_v50 }
 0x674   :  { %1318 = vmatprep.subr.bf16.mxu0 %v1542_v0  ;;  %v1149_v0 = vld [vmem:[%s1909_s14 + $0x13] ss:$0 sm:$0xff] }
 0x677   :  { %1319 = vmatpush3.bf16.msra.mxu0 %v1371_v51 }
 0x711   :  { %v605_v4 = vpop.f32.mrf.mxu1 }
 0x712   :  { %v606_v6 = vadd.f32 %v1122_v2, %v605_v4 }
 0x713   :  { %v1268_v7 = vpop.f32.mrf.mxu1 }
 0x714   :  { %v611_v9 = vmax.f32 %v606_v6, 0.0 }
 0x715   :  { %v608_v10 = vpop.f32.mrf.mxu1 }
 0x716   :  { %v612_v11 = vadd.f32 %v611_v9, %v444_v8 }
 0x717   :  { %v1269_v12 = vpop.f32.mrf.mxu1 }
 0x719   :  { %v780_v15 = vpop.f32.mrf.mxu0  ;;  %v839_v16 = vpop.f32.mrf.mxu1 }
 0x71a   :  { %v781_v17 = vadd.f32 %v1134_v13, %v780_v15  ;;  %v840_v18 = vadd.f32 %v1140_v14, %v839_v16  ;;  %v1158_v13 = vld [vmem:[%s1909_s14 + $0x14] ss:$0 sm:$0xff]  ;;  %v1159_v15 = vld [vmem:[%s1909_s14 + $0x15] ss:$0 sm:$0xff] }
 0x71b   :  { %v1294_v19 = vpop.f32.mrf.mxu1  ;;  %v1288_v20 = vpop.f32.mrf.mxu0 }
 0x71c   :  { %v786_v21 = vadd.f32 %v781_v17, %v612_v11  ;;  %v845_v5 = vsel %vm635_vm4, %v840_v18, 0.0 }
 0x71d   :  { %846 = vadd.xlane.f32.xlu1 %v845_v5  ;;  %v842_v22 = vpop.f32.mrf.mxu1  ;;  %v783_v23 = vpop.f32.mrf.mxu0 }
 0x71f   :  { %v1295_v24 = vpop.f32.mrf.mxu1  ;;  %v1289_v25 = vpop.f32.mrf.mxu0 }
 0x7a6   :  { %v847_v26 = vpop.xlane.xlu1 %846 }
 0x7a7   :  { %v849_v27 = vmul.f32 0.03125, %v847_v26 }
 0x7a9   :  { %v850_v28 = vsub.f32 %v840_v18, %v849_v27 }
 0x7ab   :  { %v851_v29 = vmul.f32 %v850_v28, %v850_v28 }
 0x7ad   :  { %v852_v30 = vsel %vm635_vm4, %v851_v29, 0.0 }
 0x7ae   :  { %853 = vadd.xlane.f32.xlu1 %v852_v30 }
 0x837   :  { %v854_v39 = vpop.xlane.xlu1 %853 }
 0x838   :  { %v855_v40 = vmul.f32 0.03125, %v854_v39 }
 0x83a   :  { %v856_v41 = vadd.f32 1e-05, %v855_v40 }
 0x83c   :  { %1380 = vrsqrt.f32 %v856_v41 }
 0x849   :  { %v1381_v42 = vpop.eup %1380 }
 0x84a   :  { %v858_v44 = vmul.f32 %v1381_v42, %v850_v28 }
 0x84c   :  { %v864_v46 = vmul.f32 %v1143_v43, %v858_v44 }
 0x84e   :  { %v870_v47 = vadd.f32 %v1144_v45, %v864_v46 }
 0x850   :  { %v871_v48 = vmax.f32 %v870_v47, 0.0 }
 0x852   :  { %v872_v49 = vpack.c.bf16 %v871_v48, %v871_v48 }
 0x854   :  { %1301 = vmatmul.mubr.msk.bf16.vlgmr.msra.gmra.mxu1 %vm635_vm4, %v872_v49 }
 0x914   :  { %v931_v53 = vpop.f32.mrf.mxu1 }
 0x915   :  { %v932_v54 = vadd.f32 %v1145_v52, %v931_v53 }
 0x916   :  { %v1302_v55 = vpop.f32.mrf.mxu1 }
 0x917   :  { %v937_v56 = vadd.f32 %v932_v54, %v786_v21 }
 0x918   :  { %v934_v57 = vpop.f32.mrf.mxu1 }
 0x919   :  { %v938_v58 = vpack.c.bf16 %v937_v56, %v937_v56 }
 0x91a   :  { %v1303_v59 = vpop.f32.mrf.mxu1 }
 0x91b   :  { %1321 = vmatmul.mubr.bf16.vlgmr.msra.gmra.mxu0 %v938_v58 }
 0x9db   :  { %v1042_v60 = vpop.f32.mrf.mxu0 }
 0x9dc   :  { %v1043_v61 = vadd.f32 %v1149_v0, %v1042_v60 }
 0x9dd   :  { %v1322_v62 = vpop.f32.mrf.mxu0 }
 0x9de   :  { %v1048_v63 = vsel %vm162_vm1, %v1043_v61, 0.0 }
 0x9df   :  { %1049 = vadd.xlane.f32.xlu0 %v1048_v63  ;;  %v1045_v1 = vpop.f32.mrf.mxu0 }
 0x9e1   :  { %v1323_v2 = vpop.f32.mrf.mxu0 }
 0xa68   :  { %v1050_v3 = vpop.xlane.xlu0 %1049 }
 0xa69   :  { %v1051_v4 = vmul.f32 0.015625, %v1050_v3 }
 0xa6b   :  { %v1052_v6 = vsub.f32 %v1043_v61, %v1051_v4 }
 0xa6d   :  { %v1053_v7 = vmul.f32 %v1052_v6, %v1052_v6 }
 0xa6f   :  { %v1054_v8 = vsel %vm162_vm1, %v1053_v7, 0.0 }
 0xa70   :  { %1055 = vadd.xlane.f32.xlu1 %v1054_v8 }
 0xaf9   :  { %v1056_v9 = vpop.xlane.xlu1 %1055 }
 0xafa   :  { %v1057_v10 = vmul.f32 0.015625, %v1056_v9 }
 0xafc   :  { %v1058_v11 = vadd.f32 1e-05, %v1057_v10 }
 0xafe   :  { %1382 = vrsqrt.f32 %v1058_v11 }
 0xb0b   :  { %v1383_v12 = vpop.eup %1382 }
 0xb0c   :  { %v1060_v14 = vmul.f32 %v1383_v12, %v1052_v6 }
 0xb0e   :  { %v1066_v16 = vmul.f32 %v1158_v13, %v1060_v14 }
 0xb10   :  { %v1072_v17 = vadd.f32 %v1159_v15, %v1066_v16 }
 0xb12   :  { %v1073_v18 = vmax.f32 %v1072_v17, 0.0 }
 0xb14   :  { %1074 = vst.msk [vmem:[#allocation13] sm:$0xff] %vm162_vm1, %v1073_v18 }
 0xb15   :  { %1515 = shalt.err (!%p1512_p6)
}
 0xb16   :  { %1084 = dma.vmem_to_hbm [thread:$0]  %s1082_s4, 128, %s1910_s15, [#allocation4]  }
 0xb17   :  { %1532 = dma.done.wait [#allocation4], 128  }
 0xb18   :  { %1533 = vsyncadd [#allocation4], 4294967168 }
 0xb19   :  { %1088 = vsyncpa [#allocation3], 1 }
 0xb1a   :  { %1089 = vsyncpa [#allocation6], 1 }
 0xb1b   :  { %1090 = vsyncpa [#allocation9], 1 }
 0xb1c   :  { %1091 = vsyncpa [#allocation12], 1 }
 0xb1d   :  { %1092 = vsyncpa [#allocation4], 1 }

</bundles_post_ra>
